<compile_context>
chip_gen: v6e
topology: v6e:2x2x1
jax: 0.10.0
libtpu: 0.0.40
codegen_flags: <defaults>
</compile_context>

<pallas_src>
import functools

import jax
import jax.numpy as jnp
from jax.experimental import pallas as pl
from jax.experimental.pallas import tpu as pltpu


def _attflow_kernel(ctx_ref, q_ref, w_ref, mask_ref, g_ref, h_ref, *, mm_dtype):
    # ctx_ref:  (bb, T, E)     q_ref: (J, E)     w_ref: (2, E) = [w1; w3]
    # mask_ref: (J, 1) f32     g_ref: (bb, T, 2E)  h_ref: (bb, J, E)
    E = q_ref.shape[-1]
    J = q_ref.shape[0]
    bb = ctx_ref.shape[0]

    c = ctx_ref[...]                       # (bb, T, E)
    q = q_ref[...]                         # (J, E)
    w1 = w_ref[0:1, :]                     # (1, E)  weights for context part
    w3 = w_ref[1:2, :]                     # (1, E)  weights for elementwise product
    mask = mask_ref[...]                   # (J, 1)  query padding mask

    # Fold w3 into the query once per block, replicate across the batch block
    # so both matmuls are plain batched QK^T / PV patterns (no transposes).
    qw3 = q * w3                                            # (J, E)
    qb = jnp.broadcast_to(qw3[None, :, :], (bb, J, E))      # (bb, J, E)

    c_mm = c
    if mm_dtype is not None:
        qb = qb.astype(mm_dtype)
        c_mm = c.astype(mm_dtype)

    # S in (J, T) orientation: S[b, j, t] = (q_j ⊙ w3)·c_t + c_t·w1.
    # (The q_j·w2 term is constant along T and cancels in the softmax.)
    s = jnp.einsum('bje,bte->bjt', qb, c_mm,
                   preferred_element_type=jnp.float32)      # (bb, J, T)
    a = jnp.sum(c * w1, axis=-1)                            # (bb, T)
    s = s + a[:, None, :]

    # Softmax over T (lane axis); approx reciprocal runs on the EUP slot.
    s_max = jnp.max(s, axis=-1, keepdims=True)
    p = jnp.exp(s - s_max)
    p = p * pl.reciprocal(jnp.sum(p, axis=-1, keepdims=True), approx=True)

    att = p * mask[None, :, :]                              # (bb, J, T)

    # G_att[b, t, e] = c[b, t, e] * sum_j att[b, j, t]
    colsum = jnp.sum(att, axis=1)                           # (bb, T)
    g_att = c * colsum[:, :, None]                          # (bb, T, E)

    # H[b, j, e] = sum_t att[b, j, t] * c[b, t, e]  (flash-attention PV shape)
    att_mm = att.astype(mm_dtype) if mm_dtype is not None else att
    h = jnp.einsum('bjt,bte->bje', att_mm, c_mm,
                   preferred_element_type=jnp.float32)      # (bb, J, E)

    # Two direct slice stores instead of materializing a lane-concat temporary.
    g_ref[:, :, :E] = c.astype(g_ref.dtype)
    g_ref[:, :, E:] = g_att.astype(g_ref.dtype)
    h_ref[...] = h.astype(h_ref.dtype)

    # NOTE: S_softmax_col (softmax over dim=2) is dead code in the PyTorch
    # forward and is intentionally omitted.


def _largest_divisor_leq(n, cap):
    for d in range(min(cap, n), 0, -1):
        if n % d == 0:
            return d
    return 1


def att_flow_layer(context, query, alpha_weight, *, block_b=8, matmul_dtype=None):
    """context: (B, T, E), query: (J, E), alpha_weight: (1, 3E). Returns (G, H).

    matmul_dtype: optionally cast MXU operands (e.g. jnp.bfloat16 on v6e/v7x
    for large T/J/E); accumulation stays f32.  For lane-dense stores, real
    model sizes should use E % 128 == 0.
    """
    B, T, E = context.shape
    J, Eq = query.shape
    assert Eq == E, "query embed dim must match context embed dim"

    w = alpha_weight.reshape(3, E)
    # rows: [w_context (w1), w_product (w3)].  The w_query (w2) row is dropped:
    # it is constant along the softmax (T) axis and cancels exactly.
    w13 = jnp.stack([w[0], w[2]], axis=0).astype(jnp.float32)          # (2, E)

    # Batch-invariant query mask, hoisted out of the kernel:
    # 1.0 where the query row does not sum to zero (== sign(|sum_e q|)).
    qmask = (jnp.sum(query.astype(jnp.float32), axis=-1, keepdims=True) != 0.0
             ).astype(jnp.float32)                                      # (J, 1)

    bb = _largest_divisor_leq(B, block_b)    # batch items per grid step
    grid = (B // bb,)

    kernel = functools.partial(_attflow_kernel, mm_dtype=matmul_dtype)

    grid_spec = pltpu.PrefetchScalarGridSpec(
        num_scalar_prefetch=0,
        grid=grid,
        in_specs=[
            pl.BlockSpec((bb, T, E), lambda i: (i, 0, 0)),
            pl.BlockSpec((J, E), lambda i: (0, 0)),
            pl.BlockSpec((2, E), lambda i: (0, 0)),
            pl.BlockSpec((J, 1), lambda i: (0, 0)),
        ],
        out_specs=[
            pl.BlockSpec((bb, T, 2 * E), lambda i: (i, 0, 0)),
            pl.BlockSpec((bb, J, E), lambda i: (i, 0, 0)),
        ],
    )

    # Rough per-step VMEM footprint (double-buffered in/out blocks); only raise
    # the scoped limit when the default 32 MiB would not fit.
    est_bytes = 2 * 4 * (bb * T * E + bb * T * 2 * E + bb * J * E + J * E)
    vmem_limit = None
    if est_bytes > 32 * 1024 * 1024:
        vmem_limit = min(int(1.5 * est_bytes), 100 * 1024 * 1024)
    # TODO(synk): for very long contexts on v7x (64 MiB VMEM), add a T-tiling
    # grid axis with flash-style online softmax instead of raising the limit.

    return pl.pallas_call(
        kernel,
        out_shape=(
            jax.ShapeDtypeStruct((B, T, 2 * E), context.dtype),
            jax.ShapeDtypeStruct((B, J, E), context.dtype),
        ),
        grid_spec=grid_spec,
        compiler_params=pltpu.CompilerParams(
            dimension_semantics=("parallel",),
            vmem_limit_bytes=vmem_limit,
        ),
    )(context, query, w13, qmask)


def att_flow_layer_ref(context, query, alpha_weight):
    """Pure-JAX reference, mirrors the PyTorch forward literally."""
    B, T, E = context.shape
    J, _ = query.shape
    q = jnp.broadcast_to(query[None], (B, J, E))
    ce = jnp.broadcast_to(context[:, :, None, :], (B, T, J, E))
    qe = jnp.broadcast_to(q[:, None, :, :], (B, T, J, E))
    cated = jnp.concatenate([ce, qe, ce * qe], axis=3)           # (B, T, J, 3E)
    S = jnp.einsum('btjk,k->btj', cated, alpha_weight[0])        # (B, T, J)
    S_row = jnp.transpose(jax.nn.softmax(S, axis=1), (0, 2, 1))  # (B, J, T)
    qmask = jnp.sign(jnp.abs(jnp.sum(q, axis=-1)))               # (B, J)
    S_row = S_row * qmask[:, :, None]
    attd = S_row[..., None] * jnp.transpose(ce, (0, 2, 1, 3))    # (B, J, T, E)
    G = jnp.sum(attd, axis=1)                                    # (B, T, E)
    H = jnp.sum(attd, axis=2)                                    # (B, J, E)
    G = jnp.concatenate([context, G], axis=2)                    # (B, T, 2E)
    return G, H


if __name__ == "__main__":
    B, T, J, E = 2, 16, 8, 32
    key = jax.random.PRNGKey(0)
    k1, k2, k3 = jax.random.split(key, 3)

    context = jax.random.normal(k1, (B, T, E), dtype=jnp.float32)
    query = jax.random.normal(k2, (J, E), dtype=jnp.float32)
    # deterministic init of nn.Linear(3E, 1, bias=False) weight, shape (1, 3E)
    alpha_weight = (jax.random.normal(k3, (1, 3 * E), dtype=jnp.float32)
                    * (1.0 / jnp.sqrt(3.0 * E)))

    G, H = att_flow_layer(context, query, alpha_weight)
    G, H = jax.block_until_ready(G), jax.block_until_ready(H)

    G_ref, H_ref = att_flow_layer_ref(context, query, alpha_weight)
    # Tolerance 2e-3: the kernel drops the (softmax-invariant) q·w2 term and
    # uses the EUP approx reciprocal for the softmax denominator.
    assert jnp.allclose(G, G_ref, atol=2e-3, rtol=2e-3), "G mismatch"
    assert jnp.allclose(H, H_ref, atol=2e-3, rtol=2e-3), "H mismatch"

    print("KERNEL_OK")
</pallas_src>

<mosaic_0001>
module attributes {stable_mosaic.version = 11 : i64} {
  func.func @_attflow_kernel(%arg0: i32, %arg1: memref<2x16x32xf32, #tpu.memory_space<vmem>>, %arg2: memref<8x32xf32, #tpu.memory_space<vmem>>, %arg3: memref<2x32xf32, #tpu.memory_space<vmem>>, %arg4: memref<8x1xf32, #tpu.memory_space<vmem>>, %arg5: memref<2x16x64xf32, #tpu.memory_space<vmem>>, %arg6: memref<2x8x32xf32, #tpu.memory_space<vmem>>) attributes {dimension_semantics = [#tpu.dimension_semantics<parallel>], iteration_bounds = array<i64: 1>, scalar_prefetch = 0 : i64, scratch_operands = 0 : i64, tpu.core_type = #tpu.core_type<tc>, window_params = [{transform_indices = @transform_0, window_bounds = array<i64: 2, 16, 32>}, {pipeline_mode = #tpu.pipeline_mode<synchronous>, transform_indices = @transform_1, window_bounds = array<i64: 8, 32>}, {pipeline_mode = #tpu.pipeline_mode<synchronous>, transform_indices = @transform_2, window_bounds = array<i64: 2, 32>}, {pipeline_mode = #tpu.pipeline_mode<synchronous>, transform_indices = @transform_3, window_bounds = array<i64: 8, 1>}, {transform_indices = @transform_4, window_bounds = array<i64: 2, 16, 64>}, {transform_indices = @transform_5, window_bounds = array<i64: 2, 8, 32>}]} {
    %c0 = arith.constant 0 : index
    %c0_0 = arith.constant 0 : index
    %c0_1 = arith.constant 0 : index
    %0 = vector.load %arg1[%c0, %c0_0, %c0_1] : memref<2x16x32xf32, #tpu.memory_space<vmem>>, vector<2x16x32xf32>
    %c0_2 = arith.constant 0 : index
    %c0_3 = arith.constant 0 : index
    %1 = vector.load %arg2[%c0_2, %c0_3] : memref<8x32xf32, #tpu.memory_space<vmem>>, vector<8x32xf32>
    %c0_4 = arith.constant 0 : index
    %c0_5 = arith.constant 0 : index
    %2 = vector.load %arg3[%c0_4, %c0_5] : memref<2x32xf32, #tpu.memory_space<vmem>>, vector<1x32xf32>
    %c1 = arith.constant 1 : index
    %c0_6 = arith.constant 0 : index
    %3 = vector.load %arg3[%c1, %c0_6] : memref<2x32xf32, #tpu.memory_space<vmem>>, vector<1x32xf32>
    %c0_7 = arith.constant 0 : index
    %c0_8 = arith.constant 0 : index
    %4 = vector.load %arg4[%c0_7, %c0_8] : memref<8x1xf32, #tpu.memory_space<vmem>>, vector<8x1xf32>
    %5 = vector.broadcast %3 : vector<1x32xf32> to vector<8x32xf32>
    %6 = arith.mulf %1, %5 : vector<8x32xf32>
    %7 = vector.shape_cast %6 : vector<8x32xf32> to vector<1x8x32xf32>
    %8 = vector.shape_cast %7 : vector<1x8x32xf32> to vector<1x8x32xf32>
    %9 = vector.broadcast %8 : vector<1x8x32xf32> to vector<2x8x32xf32>
    "tpu.trace_start"() <{level = 10 : i32, message = "bje,bte->bjt"}> : () -> ()
    %cst = arith.constant dense<0.000000e+00> : vector<2x8x16xf32>
    %10 = tpu.matmul %9, %0, %cst {dimension_numbers = #tpu.dot_dimension_numbers<[2], [2], [1], [1], [0, 0, 0, 1, 1, 1], [0], [0]>} : vector<2x8x32xf32>, vector<2x16x32xf32>, vector<2x8x16xf32> -> vector<2x8x16xf32>
    "tpu.trace_stop"() : () -> ()
    %11 = vector.shape_cast %2 : vector<1x32xf32> to vector<1x1x32xf32>
    %12 = vector.broadcast %11 : vector<1x1x32xf32> to vector<2x16x32xf32>
    %13 = arith.mulf %0, %12 : vector<2x16x32xf32>
    %cst_9 = arith.constant dense<0.000000e+00> : vector<2x16xf32>
    %14 = vector.multi_reduction <add>, %13, %cst_9 [2] : vector<2x16x32xf32> to vector<2x16xf32>
    %15 = vector.shape_cast %14 : vector<2x16xf32> to vector<2x1x16xf32>
    %16 = vector.broadcast %15 : vector<2x1x16xf32> to vector<2x8x16xf32>
    %17 = arith.addf %10, %16 : vector<2x8x16xf32>
    %cst_10 = arith.constant dense<0xFF800000> : vector<2x8xf32>
    %18 = vector.multi_reduction <maximumf>, %17, %cst_10 [2] : vector<2x8x16xf32> to vector<2x8xf32>
    %19 = vector.shape_cast %18 : vector<2x8xf32> to vector<2x8x1xf32>
    %20 = vector.broadcast %19 : vector<2x8x1xf32> to vector<2x8x16xf32>
    %21 = arith.subf %17, %20 : vector<2x8x16xf32>
    %22 = math.exp %21 : vector<2x8x16xf32>
    %cst_11 = arith.constant dense<0.000000e+00> : vector<2x8xf32>
    %23 = vector.multi_reduction <add>, %22, %cst_11 [2] : vector<2x8x16xf32> to vector<2x8xf32>
    %24 = vector.shape_cast %23 : vector<2x8xf32> to vector<2x8x1xf32>
    %25 = tpu.reciprocal %24 {approx = true} : vector<2x8x1xf32> -> vector<2x8x1xf32>
    %26 = vector.broadcast %25 : vector<2x8x1xf32> to vector<2x8x16xf32>
    %27 = arith.mulf %22, %26 : vector<2x8x16xf32>
    %28 = vector.shape_cast %4 : vector<8x1xf32> to vector<1x8x1xf32>
    %29 = vector.broadcast %28 : vector<1x8x1xf32> to vector<2x8x16xf32>
    %30 = arith.mulf %27, %29 : vector<2x8x16xf32>
    %cst_12 = arith.constant dense<0.000000e+00> : vector<2x16xf32>
    %31 = vector.multi_reduction <add>, %30, %cst_12 [1] : vector<2x8x16xf32> to vector<2x16xf32>
    %32 = vector.shape_cast %31 : vector<2x16xf32> to vector<2x16x1xf32>
    %33 = vector.broadcast %32 : vector<2x16x1xf32> to vector<2x16x32xf32>
    %34 = arith.mulf %0, %33 : vector<2x16x32xf32>
    "tpu.trace_start"() <{level = 10 : i32, message = "bjt,bte->bje"}> : () -> ()
    %cst_13 = arith.constant dense<0.000000e+00> : vector<2x8x32xf32>
    %35 = tpu.matmul %30, %0, %cst_13 {dimension_numbers = #tpu.dot_dimension_numbers<[2], [1], [1], [2], [0, 0, 0, 1, 1, 2], [0], [0]>} : vector<2x8x16xf32>, vector<2x16x32xf32>, vector<2x8x32xf32> -> vector<2x8x32xf32>
    "tpu.trace_stop"() : () -> ()
    %c0_14 = arith.constant 0 : index
    %c0_15 = arith.constant 0 : index
    %c0_16 = arith.constant 0 : index
    %36 = vector.load %arg5[%c0_14, %c0_15, %c0_16] : memref<2x16x64xf32, #tpu.memory_space<vmem>>, vector<2x16x32xf32>
    tpu.vector_store %arg5[%c0_14, %c0_15, %c0_16], %0 {strides = array<i32>} : memref<2x16x64xf32, #tpu.memory_space<vmem>>, vector<2x16x32xf32>,
    %c0_17 = arith.constant 0 : index
    %c0_18 = arith.constant 0 : index
    %c32 = arith.constant 32 : index
    %37 = vector.load %arg5[%c0_17, %c0_18, %c32] : memref<2x16x64xf32, #tpu.memory_space<vmem>>, vector<2x16x32xf32>
    tpu.vector_store %arg5[%c0_17, %c0_18, %c32], %34 {strides = array<i32>} : memref<2x16x64xf32, #tpu.memory_space<vmem>>, vector<2x16x32xf32>,
    %c0_19 = arith.constant 0 : index
    %c0_20 = arith.constant 0 : index
    %c0_21 = arith.constant 0 : index
    %38 = vector.load %arg6[%c0_19, %c0_20, %c0_21] : memref<2x8x32xf32, #tpu.memory_space<vmem>>, vector<2x8x32xf32>
    tpu.vector_store %arg6[%c0_19, %c0_20, %c0_21], %35 {strides = array<i32>} : memref<2x8x32xf32, #tpu.memory_space<vmem>>, vector<2x8x32xf32>,
    return
  }
  func.func @transform_0(%arg0: i32) -> (i32, i32, i32) {
    %c0_i32 = arith.constant 0 : i32
    %c0_i32_0 = arith.constant 0 : i32
    %c0_i32_1 = arith.constant 0 : i32
    return %arg0, %c0_i32, %c0_i32_0 : i32, i32, i32
  }
  func.func @transform_1(%arg0: i32) -> (i32, i32) {
    %c0_i32 = arith.constant 0 : i32
    %c0_i32_0 = arith.constant 0 : i32
    %c0_i32_1 = arith.constant 0 : i32
    return %c0_i32, %c0_i32_0 : i32, i32
  }
  func.func @transform_2(%arg0: i32) -> (i32, i32) {
    %c0_i32 = arith.constant 0 : i32
    %c0_i32_0 = arith.constant 0 : i32
    %c0_i32_1 = arith.constant 0 : i32
    return %c0_i32, %c0_i32_0 : i32, i32
  }
  func.func @transform_3(%arg0: i32) -> (i32, i32) {
    %c0_i32 = arith.constant 0 : i32
    %c0_i32_0 = arith.constant 0 : i32
    %c0_i32_1 = arith.constant 0 : i32
    return %c0_i32, %c0_i32_0 : i32, i32
  }
  func.func @transform_4(%arg0: i32) -> (i32, i32, i32) {
    %c0_i32 = arith.constant 0 : i32
    %c0_i32_0 = arith.constant 0 : i32
    %c0_i32_1 = arith.constant 0 : i32
    return %arg0, %c0_i32, %c0_i32_0 : i32, i32, i32
  }
  func.func @transform_5(%arg0: i32) -> (i32, i32, i32) {
    %c0_i32 = arith.constant 0 : i32
    %c0_i32_0 = arith.constant 0 : i32
    %c0_i32_1 = arith.constant 0 : i32
    return %arg0, %c0_i32, %c0_i32_0 : i32, i32, i32
  }
}

</mosaic_0001>

<bundles_post_ra>
// kernel: tpu_custom_call.1
= control target key start
LH: loop header
LB: loop body
LE: loop exit
PB: predicated region body
PF: predicated region fallthrough
CT: control target
= control target key end

     0   :  { %11 = vsyncpa [#allocation3], 0  ;;  %s797_s0 = inlined_call_operand.hbm [shape: f32[2,16,32], index: 0, kind: input, shape index: {}]   ;;  %s798_s1 = inlined_call_operand.vmem [shape: f32[8,32], index: 1, kind: input, shape index: {}]   ;;  %s799_s2 = inlined_call_operand.vmem [shape: f32[2,32], index: 2, kind: input, shape index: {}]   ;;  %s800_s3 = inlined_call_operand.vmem [shape: f32[8,1], index: 3, kind: input, shape index: {}]   ;;  %s801_s4 = inlined_call_operand.hbm [shape: f32[2,16,64], index: 4, kind: output, shape index: {0}]   ;;  %s802_s5 = inlined_call_operand.hbm [shape: f32[2,8,32], index: 5, kind: output, shape index: {1}]  }
   0x1   :  { %12 = vsyncpa [#allocation4], 0 }
   0x2   :  { %13 = vsyncpa [#allocation7], 0  ;;  %s672_s18 = smov [#allocation2]  }
   0x3   :  { %s19_s19 = sshll.u32 %s672_s18, 4  ;;  %s20_s19 = int_to_ptr.vmem [resolvable:$true] %s19_s19 }
   0x4   :  { %s614_s20 = scalar_lea.vmem %s20_s19, 512  ;;  %p619_p1 = scmp.lt.s32.totalorder %s20_s19, %s20_s19 }
   0x5   :  { %p615_p0 = scmp.ne.s32.totalorder %s20_s19, %s614_s20  ;;  %p620_p2 = scmp.lt.s32.totalorder %s614_s20, %s614_s20 }
   0x7   :  { %p621_p3 = por %p620_p2, %p619_p1 }
   0x9   :  { %p622_p4 = pnand %p621_p3, %p615_p0 }
   0xb   :  { %625 = shalt.err (!%p622_p4)
}
   0xc   :  { %s673_s21 = smov 128   ;;  %s674_s22 = smov 8  }
   0xd   :  { %25 = dma.hbm_to_vmem [thread:$0]  %s797_s0, 512, %s20_s19, [#allocation3], %s673_s21, %s673_s21, %s674_s22  }
   0xe   :  { %666 = dma.done.wait [#allocation3], 512  }
   0xf   :  { %667 = vsyncadd [#allocation3], 4294966784  ;;  %v675_v0 = vmov 0.0   ;;  %vm676_vm0 = vmmov 0   ;;  %vm56_vm1 = vcmask 261120   ;;  %v719_v1 = vld [vmem:[#allocation2 + $0x8] sm:$0xff]  ;;  %v71_v17 = vlaneseq }
  0x10   :  { %560 = vmatprep.subr.mxu0 %v675_v0  ;;  %567 = vmatprep.subr.mxu1 %v675_v0  ;;  %v721_v2 = vld [vmem:[#allocation2 + $0x18] sm:$0xff]  ;;  %v723_v3 = vld [vmem:[#allocation2] sm:$0xff]  ;;  %479 = vst.msk [vmem:[#allocation5 + $0x8] sm:$0xff] %vm56_vm1, %v719_v1  ;;  %v735_v4 = vld [vmem:[#allocation2 + $0x10] sm:$0xff]  ;;  %vm82_vm2 = vcmask 130112   ;;  %vm270_vm3 = vcmask 130048  }
  0x11   :  { %564 = vmatprep.mubr.msk.f32.mxu0 %vm676_vm0, %v675_v0  ;;  %571 = vmatprep.mubr.msk.f32.mxu1 %vm676_vm0, %v675_v0  ;;  %481 = vst.msk [vmem:[#allocation5 + $0x18] sm:$0xff] %vm56_vm1, %v721_v2  ;;  %478 = vst.msk [vmem:[#allocation5] sm:$0xff] %vm56_vm1, %v723_v3  ;;  %v39_v5 = vld [vmem:[%s798_s1] sm:$0xff]  ;;  %v72_v18 = vand.u32 127, %v71_v17  ;;  %v74_v21 = vshrl.u32 %v71_v17, 7  ;;  %v677_v41 = vmov 0  }
  0x12   :  { %561 = vmatpush3.xpose.msk.msra.mxu0 %vm56_vm1, %v719_v1  ;;  %568 = vmatpush3.xpose.msk.msra.mxu1 %vm56_vm1, %v721_v2  ;;  %v538_v6 = vld [vmem:[%s799_s2 + $0x1] ss:$0 sm:$0xff]  ;;  %480 = vst.msk [vmem:[#allocation5 + $0x10] sm:$0xff] %vm56_vm1, %v735_v4  ;;  %v539_v7 = vld [vmem:[%s799_s2] ss:$0 sm:$0xff]  ;;  %s679_s30 = smov [#allocation6]  }
  0x13   :  { %562 = vmatprep.subr.mxu0 %v675_v0  ;;  %569 = vmatprep.subr.mxu1 %v675_v0  ;;  %v52_v8 = vmul.f32 %v539_v7, %v723_v3  ;;  %v54_v9 = vmul.f32 %v539_v7, %v735_v4  ;;  %v53_v10 = vmul.f32 %v539_v7, %v719_v1  ;;  %v77_v22 = vadd.s32 4294967288, %v72_v18  ;;  %v42_v52 = vld [vmem:[%s800_s3] sm:$0xff]  ;;  %s678_s3 = smov 32   ;;  %s522_s6 = sshll.u32 %s679_s30, 4  ;;  %s523_s6 = int_to_ptr.vmem [resolvable:$true] %s522_s6 }
  0x14   :  { %v55_v11 = vmul.f32 %v539_v7, %v721_v2  ;;  %v47_v12 = vmul.f32 %v538_v6, %v39_v5  ;;  %v75_v24 = vsub.s32 %v72_v18, %v74_v21  ;;  %597 = vset.pattern.permute.xlu0 %v677_v41  ;;  %s626_s7 = scalar_lea.vmem %s523_s6, 256  ;;  %p631_p6 = scmp.lt.s32.totalorder %s523_s6, %s523_s6 }
  0x15   :  { %v57_v13 = vsel %vm56_vm1, %v52_v8, 0.0  ;;  %v63_v14 = vsel %vm56_vm1, %v54_v9, 0.0  ;;  %v60_v15 = vsel %vm56_vm1, %v53_v10, 0.0  ;;  %v80_v25 = vsub.s32 %v77_v22, %v74_v21  ;;  %p627_p5 = scmp.ne.s32.totalorder %s523_s6, %s626_s7  ;;  %p632_p7 = scmp.lt.s32.totalorder %s626_s7, %s626_s7 }
  0x16   :  { %563 = vmatpush3.xpose.msk.msra.mxu0 %vm56_vm1, %v723_v3  ;;  %570 = vmatpush3.xpose.msk.msra.mxu1 %vm56_vm1, %v735_v4  ;;  %v66_v16 = vsel %vm56_vm1, %v55_v11, 0.0 }
  0x17   :  { %58 = vadd.xlane.f32.xlu0 %v57_v13  ;;  %64 = vadd.xlane.f32.xlu1 %v63_v14  ;;  %p633_p8 = por %p632_p7, %p631_p6 }
  0x18   :  { %574 = vmatprep.subr.mxu0 %v675_v0  ;;  %581 = vmatprep.subr.mxu1 %v675_v0 }
  0x19   :  { %565 = vmatmul.mubr.msk.f32.vlgmr.msra.gmra.mxu0 %vm56_vm1, %v47_v12  ;;  %572 = vmatmul.mubr.msk.f32.vlgmr.msra.gmra.mxu1 %vm56_vm1, %v47_v12  ;;  %p634_p9 = pnand %p633_p8, %p627_p5 }
  0x1a   :  { %575 = vmatpush3.msra.mxu0 %v719_v1  ;;  %582 = vmatpush3.msra.mxu1 %v721_v2 }
  0x1b   :  { %61 = vadd.xlane.f32.xlu0 %v60_v15  ;;  %67 = vadd.xlane.f32.xlu1 %v66_v16 }
  0x1c   :  { %576 = vmatprep.subr.mxu0 %v675_v0  ;;  %583 = vmatprep.subr.mxu1 %v675_v0 }
  0x1d   :  { %577 = vmatpush3.msra.mxu0 %v723_v3  ;;  %578 = vmatprep.mubr.msk.f32.mxu0 %vm676_vm0, %v675_v0 }
  0x1e   :  { %584 = vmatpush3.msra.mxu1 %v735_v4  ;;  %585 = vmatprep.mubr.msk.f32.mxu1 %vm676_vm0, %v675_v0 }
  0xa0   :  { %v65_v19 = vpop.xlane.xlu1 %64  ;;  %v59_v20 = vpop.xlane.xlu0 %58 }
  0xa1   :  { %v181_v27 = vrot.slane %v65_v19, %v75_v24  ;;  %v76_v29 = vrot.slane %v59_v20, %v75_v24 }
  0xa4   :  { %v68_v23 = vpop.xlane.xlu1 %67  ;;  %v62_v26 = vpop.xlane.xlu0 %61 }
  0xa5   :  { %v185_v28 = vrot.slane %v68_v23, %v80_v25  ;;  %v81_v30 = vrot.slane %v62_v26, %v80_v25 }
  0xa7   :  { %v186_v31 = vsel %vm82_vm2, %v185_v28, %v181_v27  ;;  %v83_v32 = vsel %vm82_vm2, %v81_v30, %v76_v29 }
  0xd9   :  { %v172_v33 = vpop.f32.mrf.mxu0  ;;  %v266_v34 = vpop.f32.mrf.mxu1 }
  0xda   :  { %v173_v35 = vadd.f32 %v172_v33, %v83_v32  ;;  %v267_v36 = vadd.f32 %v266_v34, %v186_v31 }
  0xdb   :  { %v566_v37 = vpop.f32.mrf.mxu0  ;;  %v573_v38 = vpop.f32.mrf.mxu1 }
  0xdc   :  { %v274_v39 = vsel %vm270_vm3, %v267_v36, -inf  ;;  %v271_v40 = vsel %vm270_vm3, %v173_v35, -inf }
  0xdd   :  { %275 = vmax.xlane.f32.xlu1 %v274_v39  ;;  %272 = vmax.xlane.f32.xlu0 %v271_v40 }
 0x166   :  { %v276_v42 = vpop.xlane.xlu1 %275  ;;  %v273_v43 = vpop.xlane.xlu0 %272 }
 0x167   :  { %v278_v44 = vsub.f32 %v267_v36, %v276_v42  ;;  %v277_v45 = vsub.f32 %v173_v35, %v273_v43 }
 0x169   :  { %v281_v46 = vmul.f32 1.442695, %v278_v44  ;;  %v279_v47 = vmul.f32 1.442695, %v277_v45 }
 0x16b   :  { %598 = vpow2.f32 %v281_v46 }
 0x16c   :  { %600 = vpow2.f32 %v279_v47 }
 0x178   :  { %v599_v48 = vpop.eup %598 }
 0x179   :  { %v601_v49 = vpop.eup %600  ;;  %v286_v50 = vsel %vm270_vm3, %v599_v48, 0.0 }
 0x17a   :  { %287 = vadd.xlane.f32.xlu1 %v286_v50  ;;  %v283_v51 = vsel %vm270_vm3, %v601_v49, 0.0 }
 0x17b   :  { %284 = vadd.xlane.f32.xlu0 %v283_v51 }
 0x191   :  { %295 = vperm.xlu0 %597, %v42_v52  }
 0x203   :  { %v288_v53 = vpop.xlane.xlu1 %287 }
 0x204   :  { %602 = vrcp.f32 %v288_v53  ;;  %v285_v54 = vpop.xlane.xlu0 %284 }
 0x205   :  { %604 = vrcp.f32 %v285_v54 }
 0x20c   :  { %v296_v56 = vpop.permute.xlu0 %295 }
 0x211   :  { %v603_v55 = vpop.eup %602 }
 0x212   :  { %v605_v57 = vpop.eup %604  ;;  %v292_v58 = vmul.f32 %v603_v55, %v599_v48 }
 0x213   :  { %v291_v59 = vmul.f32 %v605_v57, %v601_v49 }
 0x214   :  { %v299_v60 = vmul.f32 %v296_v56, %v292_v58 }
 0x215   :  { %v298_v61 = vmul.f32 %v296_v56, %v291_v59 }
 0x216   :  { %v307_v62 = vsel %vm270_vm3, %v299_v60, 0.0  ;;  %586 = vmatmul.mubr.msk.f32.vlgmr.msra.gmra.mxu1 %vm270_vm3, %v299_v60 }
 0x217   :  { %v300_v63 = vsel %vm270_vm3, %v298_v61, 0.0  ;;  %v308_v0 = vrot.slane %v307_v62, 4  ;;  %579 = vmatmul.mubr.msk.f32.vlgmr.msra.gmra.mxu0 %vm270_vm3, %v298_v61 }
 0x218   :  { %v301_v5 = vrot.slane %v300_v63, 4 }
 0x219   :  { %v309_v7 = vadd.f32 %v308_v0, %v307_v62 }
 0x21a   :  { %v302_v6 = vadd.f32 %v301_v5, %v300_v63 }
 0x21b   :  { %v310_v10 = vrot.slane %v309_v7, 2 }
 0x21c   :  { %v303_v8 = vrot.slane %v302_v6, 2 }
 0x21d   :  { %v311_v13 = vadd.f32 %v310_v10, %v309_v7 }
 0x21e   :  { %v304_v9 = vadd.f32 %v303_v8, %v302_v6 }
 0x21f   :  { %v312_v14 = vrot.slane %v311_v13, 1 }
 0x220   :  { %v305_v11 = vrot.slane %v304_v9, 1 }
 0x221   :  { %v313_v15 = vadd.f32 %v312_v14, %v311_v13 }
 0x222   :  { %v306_v12 = vadd.f32 %v305_v11, %v304_v9 }
 0x224   :  { %315 = vbcast.lane.b32.xlu1 %v306_v12, 256 }
 0x228   :  { %319 = vbcast.lane.b32.xlu1 %v306_v12, 264 }
 0x22c   :  { %322 = vbcast.lane.b32.xlu1 %v313_v15, 256 }
 0x230   :  { %326 = vbcast.lane.b32.xlu1 %v313_v15, 264 }
 0x296   :  { %v316_v16 = vpop.permute.xlu1 %315 }
 0x297   :  { %v328_v17 = vmul.f32 %v316_v16, %v723_v3 }
 0x299   :  { %486 = vrot.lane.b32.xlu1 %v328_v17, %s678_s3 }
 0x29a   :  { %v320_v18 = vpop.permute.xlu1 %319 }
 0x29b   :  { %v329_v19 = vmul.f32 %v320_v18, %v719_v1 }
 0x29d   :  { %488 = vrot.lane.b32.xlu1 %v329_v19, %s678_s3 }
 0x29e   :  { %v323_v20 = vpop.permute.xlu1 %322 }
 0x29f   :  { %v330_v21 = vmul.f32 %v323_v20, %v735_v4 }
 0x2a1   :  { %490 = vrot.lane.b32.xlu1 %v330_v21, %s678_s3 }
 0x2a2   :  { %v327_v22 = vpop.permute.xlu1 %326 }
 0x2a3   :  { %v331_v23 = vmul.f32 %v327_v22, %v721_v2 }
 0x2a5   :  { %492 = vrot.lane.b32.xlu1 %v331_v23, %s678_s3 }
 0x2d6   :  { %v474_v24 = vpop.f32.mrf.mxu1 }
 0x2d7   :  { %v401_v25 = vpop.f32.mrf.mxu0  ;;  %504 = vst.msk [vmem:[#allocation6 + $0x8] sm:$0xff] %vm56_vm1, %v474_v24 }
 0x2d8   :  { %503 = vst.msk [vmem:[#allocation6] sm:$0xff] %vm56_vm1, %v401_v25  ;;  %v587_v3 = vpop.f32.mrf.mxu1 }
 0x2d9   :  { %v580_v1 = vpop.f32.mrf.mxu0 }
 0x2da   :  { %637 = shalt.err (!%p634_p9)
}
 0x2db   :  { %528 = dma.vmem_to_hbm [thread:$0]  %s523_s6, 256, %s802_s5, [#allocation7], %s673_s21, %s673_s21, %s674_s22   ;;  %vm498_vm4 = vcmask 523520  }
 0x2dc   :  { %s680_s10 = smov [#allocation5]  }
 0x2dd   :  { %s510_s11 = sshll.u32 %s680_s10, 4  ;;  %s511_s11 = int_to_ptr.vmem [resolvable:$true] %s510_s11 }
 0x2de   :  { %s646_s12 = scalar_lea.vmem %s511_s11, 512  ;;  %p651_p11 = scmp.lt.s32.totalorder %s511_s11, %s511_s11 }
 0x2df   :  { %p647_p10 = scmp.ne.s32.totalorder %s511_s11, %s646_s12  ;;  %p652_p12 = scmp.lt.s32.totalorder %s646_s12, %s646_s12 }
 0x2e1   :  { %p653_p13 = por %p652_p12, %p651_p11 }
 0x2e3   :  { %p654_p0 = pnand %p653_p13, %p647_p10 }
 0x30b   :  { %v487_v2 = vpop.permute.xlu1 %486 }
 0x30c   :  { %499 = vst.msk [vmem:[#allocation5] sm:$0xff] %vm498_vm4, %v487_v2 }
 0x30f   :  { %v489_v4 = vpop.permute.xlu1 %488 }
 0x310   :  { %500 = vst.msk [vmem:[#allocation5 + $0x8] sm:$0xff] %vm498_vm4, %v489_v4 }
 0x313   :  { %v491_v26 = vpop.permute.xlu1 %490 }
 0x314   :  { %501 = vst.msk [vmem:[#allocation5 + $0x10] sm:$0xff] %vm498_vm4, %v491_v26 }
 0x317   :  { %v493_v27 = vpop.permute.xlu1 %492 }
 0x318   :  { %502 = vst.msk [vmem:[#allocation5 + $0x18] sm:$0xff] %vm498_vm4, %v493_v27 }
 0x319   :  { %657 = shalt.err (!%p654_p0)
}
 0x31a   :  { %516 = dma.vmem_to_hbm [thread:$0]  %s511_s11, 512, %s801_s4, [#allocation4], %s673_s21, %s673_s21, %s674_s22  }
 0x31b   :  { %668 = dma.done.wait [#allocation4], 512  }
 0x31c   :  { %669 = vsyncadd [#allocation4], 4294966784 }
 0x31d   :  { %670 = dma.done.wait [#allocation7], 256  }
 0x31e   :  { %671 = vsyncadd [#allocation7], 4294967040 }
 0x31f   :  { %535 = vsyncpa [#allocation3], 1 }
 0x320   :  { %536 = vsyncpa [#allocation4], 1 }
 0x321   :  { %537 = vsyncpa [#allocation7], 1 }

</bundles_post_ra>
